<compile_context>
chip_gen: v5e
topology: v5e:2x2
jax: 0.10.0
libtpu: 0.0.40
codegen_flags: <defaults>
</compile_context>

<pallas_src>
import jax
import jax.numpy as jnp
from jax.experimental import pallas as pl
from jax.experimental.pallas import tpu as pltpu


def _round_up(v, m):
    return -(-v // m) * m


def _bsn_kernel(idx_ref, x_ref, scale_ref, shift_ref, o_ref):
    # idx_ref   : (tile_rows, 1) int32      per-row table index
    # x_ref     : (tile_rows, tile_f)       input tile
    # scale_ref : (n_batches, tile_f)       scale table (all rows, F-blocked)
    # shift_ref : (n_batches, tile_f)       shift table (all rows, F-blocked)
    # o_ref     : (tile_rows, tile_f)       output tile
    tile_rows, _ = x_ref.shape
    n_batches = scale_ref.shape[0]
    idx = idx_ref[...]                                            # (tile_rows, 1)

    if n_batches <= 8:
        # VPU broadcast-select gather: kernel is HBM-bound, VALU slots have slack.
        scale = jnp.zeros(x_ref.shape, jnp.float32)
        shift = jnp.zeros(x_ref.shape, jnp.float32)
        for b in range(n_batches):
            sel = idx == b                                        # (tile_rows, 1)
            scale = jnp.where(sel, scale_ref[b:b + 1, :].astype(jnp.float32), scale)
            shift = jnp.where(sel, shift_ref[b:b + 1, :].astype(jnp.float32), shift)
    else:
        # One-hot MXU gather; one-hot in the table dtype (no f32 table copies).
        iota = jax.lax.broadcasted_iota(jnp.int32, (tile_rows, n_batches), 1)
        onehot = (iota == idx).astype(scale_ref.dtype)            # (tile_rows, n_batches)
        scale = jnp.dot(onehot, scale_ref[...], preferred_element_type=jnp.float32)
        shift = jnp.dot(onehot, shift_ref[...], preferred_element_type=jnp.float32)

    x = x_ref[...].astype(jnp.float32)
    o_ref[...] = (x * scale + shift).astype(o_ref.dtype)          # single lane-dense store


def batch_specific_norm(x, batch_idx, scale_w, shift_w, *, tile_rows=None, tile_f=None):
    """Pallas TPU implementation of BatchSpecificNorm.forward(x, batch_idx)."""
    B, F = x.shape
    n_batches, Fw = scale_w.shape
    assert Fw == F and shift_w.shape == (n_batches, F)
    assert batch_idx.shape == (B,)

    x_bytes = jnp.dtype(x.dtype).itemsize
    t_bytes = jnp.dtype(scale_w.dtype).itemsize
    row_mult = 16 if x_bytes < 4 else 8            # sublane alignment for the row axis

    # Per-generation budgets. v7x-like parts: 64 MiB VMEM/TC, ~3.2 TB/s HBM ->
    # bigger per-step target but tighter VMEM budget. v5e/v6e: 128 MiB VMEM.
    try:
        vmem_cap = pltpu.get_tpu_info().vmem_capacity_bytes
    except Exception:                               # fall back to smallest (v7x) part
        vmem_cap = 64 << 20
    small_vmem = vmem_cap < (128 << 20)
    if small_vmem:
        budget, vmem_limit, target_step_bytes = 36 << 20, 48 << 20, 6 << 20
    else:
        budget, vmem_limit, target_step_bytes = 56 << 20, 80 << 20, 4 << 20

    # Feature-axis blocking keeps the output last dim a large multiple of 128.
    if tile_f is None:
        tile_f = min(F, 2048) if F % 128 == 0 else F
        # TODO(synk): for F not a multiple of 128, pad F (x + tables) in the
        # wrapper so stores are unmasked; masked vst is still correct here.

    def vmem_estimate(tr, tf):
        tfp = _round_up(tf, 128)                    # lane padding in VMEM
        nbp = _round_up(n_batches, 8)
        io = 2 * tr * tfp * 2 * x_bytes             # x + out tiles, double-buffered
        idx_v = 2 * tr * 128 * 4                    # (tr, 1) idx column, lane-padded
        tables = 2 * 2 * nbp * tfp * t_bytes        # both tables, double-buffered
        interm = 3 * tr * tfp * 4                   # f32 scale/shift/x temporaries
        return io + idx_v + tables + interm

    if tile_rows is None:
        # Size rows for ~target_step_bytes of x+out HBM traffic per grid step.
        tile_rows = max(512, target_step_bytes // (_round_up(tile_f, 128) * 2 * x_bytes))
        tile_rows = min(tile_rows, 8192)
    tile_rows = _round_up(max(row_mult, tile_rows), row_mult)
    tile_rows = min(tile_rows, _round_up(B, row_mult))
    if small_vmem and B >= 2 * row_mult:
        # v7x has 2 TensorCores: keep >= 2 row steps so "parallel" can shard.
        tile_rows = min(tile_rows, _round_up(-(-B // 2), row_mult))

    # Fit the VMEM budget: block F further before shrinking the row tile.
    while (vmem_estimate(tile_rows, tile_f) > budget
           and tile_f % 128 == 0 and tile_f > 128):
        tile_f = max(128, _round_up(tile_f // 2, 128))
    while vmem_estimate(tile_rows, tile_f) > budget and tile_rows > row_mult:
        tile_rows = _round_up(max(row_mult, tile_rows // 2), row_mult)

    grid = (pl.cdiv(F, tile_f), pl.cdiv(B, tile_rows))   # F outer, rows inner
    idx2d = batch_idx.astype(jnp.int32).reshape(B, 1)

    return pl.pallas_call(
        _bsn_kernel,
        out_shape=jax.ShapeDtypeStruct((B, F), x.dtype),
        grid=grid,
        in_specs=[
            pl.BlockSpec((tile_rows, 1), lambda j, i: (i, 0)),        # idx column
            pl.BlockSpec((tile_rows, tile_f), lambda j, i: (i, j)),   # x tile
            pl.BlockSpec((n_batches, tile_f), lambda j, i: (0, j)),   # scale table
            pl.BlockSpec((n_batches, tile_f), lambda j, i: (0, j)),   # shift table
        ],
        out_specs=pl.BlockSpec((tile_rows, tile_f), lambda j, i: (i, j)),
        compiler_params=pltpu.CompilerParams(
            dimension_semantics=("parallel", "parallel"),
            vmem_limit_bytes=vmem_limit,
        ),
    )(idx2d, x, scale_w, shift_w)


if __name__ == "__main__":
    key = jax.random.PRNGKey(0)
    kx, ki, ks, kh, kx2, ki2, kx3, ki3, ks3, kh3 = jax.random.split(key, 10)

    # ---- small-n_batches (VPU select) path --------------------------------
    n_batches, F, B = 4, 128, 16
    x = jax.random.normal(kx, (B, F), dtype=jnp.float32)
    batch_idx = jax.random.randint(ki, (B,), 0, n_batches, dtype=jnp.int32)

    # Parameters exactly as in BatchSpecificNorm.__init__ (ones / zeros init).
    scale_w = jnp.ones((n_batches, F), jnp.float32)
    shift_w = jnp.zeros((n_batches, F), jnp.float32)
    out = jax.block_until_ready(batch_specific_norm(x, batch_idx, scale_w, shift_w))
    ref = x * scale_w[batch_idx] + shift_w[batch_idx]
    assert out.shape == x.shape and out.dtype == x.dtype
    assert jnp.allclose(out, ref, atol=1e-6)

    # Non-trivial tables so the per-row gather is actually exercised.
    scale2 = 1.0 + 0.1 * jax.random.normal(ks, (n_batches, F), jnp.float32)
    shift2 = 0.1 * jax.random.normal(kh, (n_batches, F), jnp.float32)
    out2 = jax.block_until_ready(batch_specific_norm(x, batch_idx, scale2, shift2))
    assert jnp.allclose(out2, x * scale2[batch_idx] + shift2[batch_idx], atol=1e-5)

    # Ragged row count (B % 8 != 0): exercises the masked last block (no pad/slice).
    B3 = 13
    x3 = jax.random.normal(kx2, (B3, F), dtype=jnp.float32)
    idx3 = jax.random.randint(ki2, (B3,), 0, n_batches, dtype=jnp.int32)
    out3 = jax.block_until_ready(batch_specific_norm(x3, idx3, scale2, shift2))
    assert out3.shape == (B3, F)
    assert jnp.allclose(out3, x3 * scale2[idx3] + shift2[idx3], atol=1e-5)

    # Mixed dtype: bf16 activations with f32 tables (explicit cast on store).
    xb = x.astype(jnp.bfloat16)
    outb = jax.block_until_ready(batch_specific_norm(xb, batch_idx, scale2, shift2))
    refb = (xb.astype(jnp.float32) * scale2[batch_idx]
            + shift2[batch_idx]).astype(jnp.bfloat16)
    assert outb.dtype == jnp.bfloat16
    assert jnp.allclose(outb.astype(jnp.float32), refb.astype(jnp.float32),
                        atol=2e-2, rtol=2e-2)

    # ---- large-n_batches (one-hot MXU) path --------------------------------
    n_b4, F4, B4 = 16, 256, 24
    x4 = jax.random.normal(kx3, (B4, F4), dtype=jnp.float32)
    idx4 = jax.random.randint(ki3, (B4,), 0, n_b4, dtype=jnp.int32)
    scale4 = 1.0 + 0.1 * jax.random.normal(ks3, (n_b4, F4), jnp.float32)
    shift4 = 0.1 * jax.random.normal(kh3, (n_b4, F4), jnp.float32)
    out4 = jax.block_until_ready(batch_specific_norm(x4, idx4, scale4, shift4))
    assert jnp.allclose(out4, x4 * scale4[idx4] + shift4[idx4], atol=1e-5)

    print("KERNEL_OK")
</pallas_src>

<mosaic_0001>
module attributes {stable_mosaic.version = 11 : i64} {
  func.func @_bsn_kernel(%arg0: i32, %arg1: i32, %arg2: memref<8x1xi32, #tpu.memory_space<vmem>>, %arg3: memref<8x128xf32, #tpu.memory_space<vmem>>, %arg4: memref<4x128xf32, #tpu.memory_space<vmem>>, %arg5: memref<4x128xf32, #tpu.memory_space<vmem>>, %arg6: memref<8x128xf32, #tpu.memory_space<vmem>>) attributes {dimension_semantics = [#tpu.dimension_semantics<parallel>, #tpu.dimension_semantics<parallel>], iteration_bounds = array<i64: 1, 2>, scalar_prefetch = 0 : i64, scratch_operands = 0 : i64, tpu.core_type = #tpu.core_type<tc>, window_params = [{transform_indices = @transform_0, window_bounds = array<i64: 8, 1>}, {transform_indices = @transform_1, window_bounds = array<i64: 8, 128>}, {transform_indices = @transform_2, window_bounds = array<i64: 4, 128>}, {transform_indices = @transform_3, window_bounds = array<i64: 4, 128>}, {transform_indices = @transform_4, window_bounds = array<i64: 8, 128>}]} {
    %c0 = arith.constant 0 : index
    %c0_0 = arith.constant 0 : index
    %0 = vector.load %arg2[%c0, %c0_0] : memref<8x1xi32, #tpu.memory_space<vmem>>, vector<8x1xi32>
    %cst = arith.constant 0.000000e+00 : f32
    %1 = vector.broadcast %cst : f32 to vector<8x128xf32>
    %cst_1 = arith.constant 0.000000e+00 : f32
    %2 = vector.broadcast %cst_1 : f32 to vector<8x128xf32>
    %c0_i32 = arith.constant 0 : i32
    %3 = vector.broadcast %c0_i32 : i32 to vector<8x1xi32>
    %4 = arith.cmpi eq, %0, %3 : vector<8x1xi32>
    %c0_2 = arith.constant 0 : index
    %c0_3 = arith.constant 0 : index
    %5 = vector.load %arg4[%c0_2, %c0_3] : memref<4x128xf32, #tpu.memory_space<vmem>>, vector<1x128xf32>
    %6 = vector.shape_cast %4 : vector<8x1xi1> to vector<8x1xi1>
    %7 = vector.broadcast %6 : vector<8x1xi1> to vector<8x128xi1>
    %8 = vector.shape_cast %5 : vector<1x128xf32> to vector<1x128xf32>
    %9 = vector.broadcast %8 : vector<1x128xf32> to vector<8x128xf32>
    %10 = arith.select %7, %9, %1 : vector<8x128xi1>, vector<8x128xf32>
    %c0_4 = arith.constant 0 : index
    %c0_5 = arith.constant 0 : index
    %11 = vector.load %arg5[%c0_4, %c0_5] : memref<4x128xf32, #tpu.memory_space<vmem>>, vector<1x128xf32>
    %12 = vector.shape_cast %4 : vector<8x1xi1> to vector<8x1xi1>
    %13 = vector.broadcast %12 : vector<8x1xi1> to vector<8x128xi1>
    %14 = vector.shape_cast %11 : vector<1x128xf32> to vector<1x128xf32>
    %15 = vector.broadcast %14 : vector<1x128xf32> to vector<8x128xf32>
    %16 = arith.select %13, %15, %2 : vector<8x128xi1>, vector<8x128xf32>
    %c1_i32 = arith.constant 1 : i32
    %17 = vector.broadcast %c1_i32 : i32 to vector<8x1xi32>
    %18 = arith.cmpi eq, %0, %17 : vector<8x1xi32>
    %c1 = arith.constant 1 : index
    %c0_6 = arith.constant 0 : index
    %19 = vector.load %arg4[%c1, %c0_6] : memref<4x128xf32, #tpu.memory_space<vmem>>, vector<1x128xf32>
    %20 = vector.shape_cast %18 : vector<8x1xi1> to vector<8x1xi1>
    %21 = vector.broadcast %20 : vector<8x1xi1> to vector<8x128xi1>
    %22 = vector.shape_cast %19 : vector<1x128xf32> to vector<1x128xf32>
    %23 = vector.broadcast %22 : vector<1x128xf32> to vector<8x128xf32>
    %24 = arith.select %21, %23, %10 : vector<8x128xi1>, vector<8x128xf32>
    %c1_7 = arith.constant 1 : index
    %c0_8 = arith.constant 0 : index
    %25 = vector.load %arg5[%c1_7, %c0_8] : memref<4x128xf32, #tpu.memory_space<vmem>>, vector<1x128xf32>
    %26 = vector.shape_cast %18 : vector<8x1xi1> to vector<8x1xi1>
    %27 = vector.broadcast %26 : vector<8x1xi1> to vector<8x128xi1>
    %28 = vector.shape_cast %25 : vector<1x128xf32> to vector<1x128xf32>
    %29 = vector.broadcast %28 : vector<1x128xf32> to vector<8x128xf32>
    %30 = arith.select %27, %29, %16 : vector<8x128xi1>, vector<8x128xf32>
    %c2_i32 = arith.constant 2 : i32
    %31 = vector.broadcast %c2_i32 : i32 to vector<8x1xi32>
    %32 = arith.cmpi eq, %0, %31 : vector<8x1xi32>
    %c2 = arith.constant 2 : index
    %c0_9 = arith.constant 0 : index
    %33 = vector.load %arg4[%c2, %c0_9] : memref<4x128xf32, #tpu.memory_space<vmem>>, vector<1x128xf32>
    %34 = vector.shape_cast %32 : vector<8x1xi1> to vector<8x1xi1>
    %35 = vector.broadcast %34 : vector<8x1xi1> to vector<8x128xi1>
    %36 = vector.shape_cast %33 : vector<1x128xf32> to vector<1x128xf32>
    %37 = vector.broadcast %36 : vector<1x128xf32> to vector<8x128xf32>
    %38 = arith.select %35, %37, %24 : vector<8x128xi1>, vector<8x128xf32>
    %c2_10 = arith.constant 2 : index
    %c0_11 = arith.constant 0 : index
    %39 = vector.load %arg5[%c2_10, %c0_11] : memref<4x128xf32, #tpu.memory_space<vmem>>, vector<1x128xf32>
    %40 = vector.shape_cast %32 : vector<8x1xi1> to vector<8x1xi1>
    %41 = vector.broadcast %40 : vector<8x1xi1> to vector<8x128xi1>
    %42 = vector.shape_cast %39 : vector<1x128xf32> to vector<1x128xf32>
    %43 = vector.broadcast %42 : vector<1x128xf32> to vector<8x128xf32>
    %44 = arith.select %41, %43, %30 : vector<8x128xi1>, vector<8x128xf32>
    %c3_i32 = arith.constant 3 : i32
    %45 = vector.broadcast %c3_i32 : i32 to vector<8x1xi32>
    %46 = arith.cmpi eq, %0, %45 : vector<8x1xi32>
    %c3 = arith.constant 3 : index
    %c0_12 = arith.constant 0 : index
    %47 = vector.load %arg4[%c3, %c0_12] : memref<4x128xf32, #tpu.memory_space<vmem>>, vector<1x128xf32>
    %48 = vector.shape_cast %46 : vector<8x1xi1> to vector<8x1xi1>
    %49 = vector.broadcast %48 : vector<8x1xi1> to vector<8x128xi1>
    %50 = vector.shape_cast %47 : vector<1x128xf32> to vector<1x128xf32>
    %51 = vector.broadcast %50 : vector<1x128xf32> to vector<8x128xf32>
    %52 = arith.select %49, %51, %38 : vector<8x128xi1>, vector<8x128xf32>
    %c3_13 = arith.constant 3 : index
    %c0_14 = arith.constant 0 : index
    %53 = vector.load %arg5[%c3_13, %c0_14] : memref<4x128xf32, #tpu.memory_space<vmem>>, vector<1x128xf32>
    %54 = vector.shape_cast %46 : vector<8x1xi1> to vector<8x1xi1>
    %55 = vector.broadcast %54 : vector<8x1xi1> to vector<8x128xi1>
    %56 = vector.shape_cast %53 : vector<1x128xf32> to vector<1x128xf32>
    %57 = vector.broadcast %56 : vector<1x128xf32> to vector<8x128xf32>
    %58 = arith.select %55, %57, %44 : vector<8x128xi1>, vector<8x128xf32>
    %c0_15 = arith.constant 0 : index
    %c0_16 = arith.constant 0 : index
    %59 = vector.load %arg3[%c0_15, %c0_16] : memref<8x128xf32, #tpu.memory_space<vmem>>, vector<8x128xf32>
    %60 = arith.mulf %59, %52 : vector<8x128xf32>
    %61 = arith.addf %60, %58 : vector<8x128xf32>
    %c0_17 = arith.constant 0 : index
    %c0_18 = arith.constant 0 : index
    %62 = vector.load %arg6[%c0_17, %c0_18] : memref<8x128xf32, #tpu.memory_space<vmem>>, vector<8x128xf32>
    tpu.vector_store %arg6[%c0_17, %c0_18], %61 {strides = array<i32>} : memref<8x128xf32, #tpu.memory_space<vmem>>, vector<8x128xf32>,
    return
  }
  func.func @transform_0(%arg0: i32, %arg1: i32) -> (i32, i32) {
    %c0_i32 = arith.constant 0 : i32
    %c0_i32_0 = arith.constant 0 : i32
    return %arg1, %c0_i32 : i32, i32
  }
  func.func @transform_1(%arg0: i32, %arg1: i32) -> (i32, i32) {
    %c0_i32 = arith.constant 0 : i32
    return %arg1, %arg0 : i32, i32
  }
  func.func @transform_2(%arg0: i32, %arg1: i32) -> (i32, i32) {
    %c0_i32 = arith.constant 0 : i32
    %c0_i32_0 = arith.constant 0 : i32
    return %c0_i32, %arg0 : i32, i32
  }
  func.func @transform_3(%arg0: i32, %arg1: i32) -> (i32, i32) {
    %c0_i32 = arith.constant 0 : i32
    %c0_i32_0 = arith.constant 0 : i32
    return %c0_i32, %arg0 : i32, i32
  }
  func.func @transform_4(%arg0: i32, %arg1: i32) -> (i32, i32) {
    %c0_i32 = arith.constant 0 : i32
    return %arg1, %arg0 : i32, i32
  }
}

</mosaic_0001>

<bundles_post_ra>
// kernel: tpu_custom_call.1
= control target key start
LH: loop header
LB: loop body
LE: loop exit
PB: predicated region body
PF: predicated region fallthrough
CT: control target
= control target key end

     0   :  { %9 = vsyncpa [#allocation3], 0  ;;  %s869_s0 = inlined_call_operand.vmem [shape: s32[16,1], index: 0, kind: input, shape index: {}]   ;;  %s870_s1 = inlined_call_operand.vmem [shape: f32[16,128], index: 1, kind: input, shape index: {}]   ;;  %s871_s2 = inlined_call_operand.hbm [shape: f32[4,128], index: 2, kind: input, shape index: {}]   ;;  %s872_s3 = inlined_call_operand.hbm [shape: f32[4,128], index: 3, kind: input, shape index: {}]   ;;  %s873_s4 = inlined_call_operand.hbm [shape: f32[16,128], index: 4, kind: output, shape index: {}]  }
   0x1   :  { %10 = vsyncpa [#allocation6], 0 }
   0x2   :  { %11 = vsyncpa [#allocation4], 0 }
   0x3   :  { %13 = vsyncpa [#allocation4 + $0x1], 0  ;;  %s737_s15 = smov 0   ;;  %s739_s16 = smov 0  }
   0x4   :  { %s741_s17 = smov 0   ;;  %s743_s18 = smov 0  }
   0x5   :  { %s745_s19 = smov 0   ;;  %s747_s20 = smov 0  }
   0x6 LB: > { %s458_s21 = sadd.s32 4294967295, %s707_s20   ;;  %s459_s22 = sadd.s32 4294967294, %s707_s20   ;;  %s707_s20 = sphi %s747_s20, %s19_s20   ;;  %s703_s19 = sphi %s745_s19, %s882_s19   ;;  %s699_s18 = sphi %s743_s18, %s881_s18   ;;  %s695_s17 = sphi %s741_s17, %s880_s17   ;;  %s691_s16 = sphi %s739_s16, %s879_s16   ;;  %s687_s15 = sphi %s737_s15, %s878_s15  }
   0x7   : > { %s28_s23 = sadd.s32 1, %s703_s19  ;;  %s146_s24 = sadd.s32 1, %s695_s17 }
   0x8   : > { %p29_p0 = scmp.ge.s32.totalorder %s28_s23, 2  ;;  %p156_p1 = scmp.ne.s32.totalorder %s695_s17, %s691_s16 }
   0x9   : > { %p157_p2 = scmp.eq.s32.totalorder %s458_s21, 1  ;;  %p162_p3 = scmp.ne.s32.totalorder %s691_s16, %s687_s15 }
   0xa   : > { %s884_s23 = smov (%p29_p0, %s28_s23), 0  ;;  %p163_p5 = scmp.eq.s32.totalorder %s459_s22, 1 }
   0xb   : > { %p777_p4 = por %p157_p2, %p156_p1  ;;  %s141_s26 = ssub.s32 %s703_s19, %s884_s23 }
   0xc   : > { %p460_p6 = scmp.ge.s32.totalorder %s707_s20, 1  ;;  %p144_p7 = scmp.eq.s32.totalorder %s141_s26, 0 }
   0xd   : > { %p784_p8 = por %p163_p5, %p162_p3  ;;  %p170_p9 = scmp.lt.s32.totalorder %s707_s20, 3 }
   0xe   : > { %s790_s28 = scalar_select %p144_p7, %s695_s17, %s146_s24  }
   0xf   : > { %p792_p10 = pnand %p460_p6, %p170_p9  ;;  %p796_p11 = scmp.eq.s32.totalorder %s458_s21, 0 }
  0x10   : > { %s184_s7 = sshll.u32 %s871_s2, 4  ;;  %s709_s8 = smov [#allocation2]   ;;  %s185_s7 = int_to_ptr.hbm [resolvable:$true] %s184_s7 }
  0x11   : > { %p484_p12 = pneg %p792_p10  ;;  %s186_s9 = sshll.u32 %s709_s8, 4  ;;  %s187_s9 = int_to_ptr.vmem [resolvable:$true] %s186_s9 }
  0x12   : > { %s198_s12 = sshll.u32 %s872_s3, 4  ;;  %s710_s13 = smov [#allocation5]   ;;  %s199_s12 = int_to_ptr.hbm [resolvable:$true] %s198_s12 }
  0x13   : > { %p485_p13 = pnand %p796_p11, %p484_p12  ;;  %s200_s14 = sshll.u32 %s710_s13, 4  ;;  %s201_s14 = int_to_ptr.vmem [resolvable:$true] %s200_s14 }
  0x14   : > { %230 = sbr.rel (%p792_p10) target bundleno = 171 (0xab), region = 36 }
  0x15   : > { %487 = dma.hbm_to_vmem [thread:$0]  (!%p485_p13), %s185_s7, 64, %s187_s9, [#allocation3]  }
  0x16   : > { %490 = dma.hbm_to_vmem [thread:$0]  (!%p485_p13), %s199_s12, 64, %s201_s14, [#allocation6]  }
  0x19   : > { %674 = dma.done.wait (%p796_p11), [#allocation3], 64  }
  0x1a   : > { %676 = vsyncadd (%p796_p11), [#allocation3], 4294967232 }
  0x1b   : > { %678 = dma.done.wait (%p796_p11), [#allocation6], 64  }
  0x1c   : > { %680 = vsyncadd (%p796_p11), [#allocation6], 4294967232  ;;  %p268_p0 = scmp.lt.s32.totalorder %s699_s18, 1  ;;  %v711_v0 = vmov 0   ;;  %s265_s30 = sand.u32 1, %s691_s16  }
  0x1d   : > { %552 = vset.pattern.permute.xlu1 %v711_v0  ;;  %551 = vset.pattern.permute.xlu0 %v711_v0  ;;  %v553_v8 = vld [vmem:[#allocation2] ss:$0 sm:$0xff]  ;;  %v554_v9 = vld [vmem:[#allocation5] ss:$0 sm:$0xff]  ;;  %s471_s5 = sshll.u32 %s699_s18, 3  ;;  %s467_s6 = sshll.u32 %s265_s30, 3 }
  0x1e   : > { %s269_s21 = scalar_select %p268_p0, %s699_s18, 1  ;;  %v555_v10 = vld [vmem:[#allocation2 + $0x1] ss:$0 sm:$0xff]  ;;  %v556_v11 = vld [vmem:[#allocation5 + $0x1] ss:$0 sm:$0xff] }
  0x1f   : > { %v557_v12 = vld [vmem:[#allocation2 + $0x2] ss:$0 sm:$0xff]  ;;  %v558_v13 = vld [vmem:[#allocation5 + $0x2] ss:$0 sm:$0xff]  ;;  %v559_v15 = vld [vmem:[#allocation2 + $0x3] ss:$0 sm:$0xff]  ;;  %s344_s18 = scalar_lea.hbm %s873_s4, %s471_s5 }
  0x20   : > { %s468_s22 = sshll.u32 %s269_s21, 3  ;;  %v560_v19 = vld [vmem:[#allocation5 + $0x3] ss:$0 sm:$0xff]  ;;  %s267_s12 = scalar_lea.vmem [#allocation7], %s467_s6 }
  0x21   : > { %s271_s29 = scalar_lea.vmem %s869_s0, %s468_s22  ;;  %s278_s9 = scalar_lea.vmem %s870_s1, %s468_s22 }
  0x22   : > { %v279_v1 = vld [vmem:[%s271_s29] sm:$0xff]  ;;  %s346_s13 = sshll.u32 %s267_s12, 4  ;;  %s348_s14 = sshll.u32 %s344_s18, 4  ;;  %s347_s13 = int_to_ptr.vmem [resolvable:$true] %s346_s13  ;;  %s349_s14 = int_to_ptr.hbm [resolvable:$true] %s348_s14 }
  0x23   : > { %vm304_vm0 = vcmp.eq.s32.totalorder %v279_v1, 2  ;;  %vm280_vm1 = vcmp.eq.s32.totalorder %v279_v1, 0  ;;  %vm316_vm2 = vcmp.eq.s32.totalorder %v279_v1, 3  ;;  %vm292_vm3 = vcmp.eq.s32.totalorder %v279_v1, 1  ;;  %v328_v20 = vld [vmem:[%s278_s9] sm:$0xff]  ;;  %s333_s21 = scalar_lea.sflag [#allocation4], %s265_s30 }
  0x24   : > { %v306_v2 = vsel %vm304_vm0, 1, %v711_v0  ;;  %v282_v3 = vsel %vm280_vm1, 1, %v711_v0  ;;  %v318_v4 = vsel %vm316_vm2, 1, %v711_v0  ;;  %v294_v5 = vsel %vm292_vm3, 1, %v711_v0  ;;  %s635_s22 = sshra.s32 %s349_s14, 4  ;;  %s641_s5 = scalar_lea.hbm %s873_s4, 16  ;;  %s636_s22 = int_to_ptr.hbm [resolvable:$true] %s635_s22 }
  0x25   : > { %308 = vperm.xlu1 %552, %v306_v2   ;;  %284 = vperm.xlu0 %551, %v282_v3   ;;  %s637_s24 = scalar_lea.hbm %s636_s22, 8  ;;  %p642_p5 = scmp.lt.s32.totalorder %s636_s22, %s873_s4 }
  0x26   : > { %p638_p1 = scmp.ne.s32.totalorder %s636_s22, %s637_s24  ;;  %p643_p6 = scmp.lt.s32.totalorder %s641_s5, %s637_s24 }
  0x28   : > { %p639_p2 = pnand %p638_p1, %p777_p4  ;;  %p644_p7 = por %p643_p6, %p642_p5 }
  0x2a   : > { %p640_p3 = pneg %p639_p2 }
  0x2c   : > { %p645_p9 = pnand %p644_p7, %p640_p3 }
  0x2d   : > { %320 = vperm.xlu1 %552, %v318_v4   ;;  %296 = vperm.xlu0 %551, %v294_v5  }
  0x97   : > { %v309_v6 = vpop.permute.xlu1 %308  ;;  %v285_v7 = vpop.permute.xlu0 %284 }
  0x98   : > { %vm286_vm4 = vcmp.eq.s32.totalorder %v285_v7, 1  ;;  %vm310_vm6 = vcmp.eq.s32.totalorder %v309_v6, 1 }
  0x99   : > { %v288_v17 = vsel %vm286_vm4, %v553_v8, 0.0  ;;  %v291_v18 = vsel %vm286_vm4, %v554_v9, 0.0 }
  0x9f   : > { %v321_v14 = vpop.permute.xlu1 %320  ;;  %v297_v16 = vpop.permute.xlu0 %296 }
  0xa0   : > { %vm298_vm5 = vcmp.eq.s32.totalorder %v297_v16, 1  ;;  %vm322_vm7 = vcmp.eq.s32.totalorder %v321_v14, 1 }
  0xa1   : > { %v300_v21 = vsel %vm298_vm5, %v555_v10, %v288_v17  ;;  %v303_v22 = vsel %vm298_vm5, %v556_v11, %v291_v18 }
  0xa2   : > { %v312_v23 = vsel %vm310_vm6, %v557_v12, %v300_v21  ;;  %v315_v24 = vsel %vm310_vm6, %v558_v13, %v303_v22 }
  0xa3   : > { %v324_v25 = vsel %vm322_vm7, %v559_v15, %v312_v23  ;;  %v327_v27 = vsel %vm322_vm7, %v560_v19, %v315_v24 }
  0xa4   : > { %v329_v26 = vmul.f32 %v328_v20, %v324_v25 }
  0xa6   : > { %v330_v28 = vadd.f32 %v329_v26, %v327_v27 }
  0xa8   : > { %331 = vst [vmem:[%s267_s12] sm:$0xff] %v330_v28 }
  0xa9   : > { %648 = shalt.err (!%p645_p9)
}
  0xaa   : > { %482 = dma.vmem_to_hbm [thread:$0]  (%p777_p4), %s347_s13, 128, %s349_s14, %s333_s21  }
  0xab PF: > { %p499_p10 = scmp.ge.s32.totalorder %s707_s20, 2  ;;  %s360_s30 = sand.u32 1, %s687_s15  }
  0xac   : > { %s361_s8 = scalar_lea.sflag [#allocation4], %s360_s30 }
  0xad   : > { %p492_p11 = pnand %p499_p10, %p784_p8 }
  0xaf   : > { %p493_p12 = pneg %p492_p11 }
  0xb1   : > { %682 = dma.done.wait (%p493_p12), %s361_s8, 128  }
  0xb2   : > { %684 = vsyncadd (%p493_p12), %s361_s8, 4294967168  ;;  %s19_s20 = sadd.s32 1, %s707_s20   ;;  %s878_s15 = smov %s691_s16 }
  0xb3   : > { %p16_p13 = scmp.ge.s32.totalorder %s19_s20, 4   ;;  %s879_s16 = smov %s695_s17 }
  0xb4   : > { %s880_s17 = smov %s790_s28  ;;  %s881_s18 = smov %s703_s19 }
  0xb5   : > { %s882_s19 = smov %s884_s23  ;;  %18 = sbr.rel (!%p16_p13) target bundleno = 6 (0x6), region = 85 }
  0xba   :  { %367 = vsyncpa [#allocation3], 1 }
  0xbb   :  { %369 = vsyncpa [#allocation3 + $0x1], 1 }
  0xbc   :  { %370 = vsyncpa [#allocation6], 1 }
  0xbd   :  { %371 = vsyncpa [#allocation4], 1 }
  0xbe   :  { %373 = vsyncpa [#allocation4 + $0x1], 1 }

</bundles_post_ra>
